<compile_context>
chip_gen: v7x
topology: tpu7x:2x2x1
jax: 0.10.0
libtpu: 0.0.40
codegen_flags: <defaults>
</compile_context>

<pallas_src>
import functools

import jax
import jax.numpy as jnp
from jax.experimental import pallas as pl
from jax.experimental.pallas import tpu as pltpu


def _round_up(x, m):
    return (x + m - 1) // m * m


def _dqn_kernel(x_ref, w1_ref, w2_ref, w3_ref, bias_ref, o_ref, *, h_p, d_out_p):
    # Fused bias buffer layout: [b1 (h_p) | b2 (h_p) | b3 (d_out_p)]  (f32)
    b1 = bias_ref[:, 0:h_p]
    b2 = bias_ref[:, h_p:2 * h_p]
    b3 = bias_ref[:, 2 * h_p:2 * h_p + d_out_p]

    # Layer 1: Linear (bf16 MXU, f32 acc) + bias + ReLU.  Dropout = identity.
    h1 = jnp.dot(x_ref[...], w1_ref[...], preferred_element_type=jnp.float32)
    h1 = jnp.maximum(h1 + b1, 0.0)

    # Layer 2: Linear + bias + ReLU.  Dropout = identity.
    h2 = jnp.dot(h1.astype(jnp.bfloat16), w2_ref[...],
                 preferred_element_type=jnp.float32)
    h2 = jnp.maximum(h2 + b2, 0.0)

    # Layer 3: Linear (Q-value head).
    out = jnp.dot(h2.astype(jnp.bfloat16), w3_ref[...],
                  preferred_element_type=jnp.float32) + b3
    o_ref[...] = out.astype(o_ref.dtype)


def dqn_forward(x, params, *, tb=256):
    """x: [B, input_dim] f32.  params: (w1, b1, w2, b2, w3, b3) with weights
    stored [in_features, out_features] and biases [1, out_features]."""
    w1, b1, w2, b2, w3, b3 = params
    B, d_in = x.shape
    h = w1.shape[1]
    d_out = w3.shape[1]

    # Lane-pad every feature dim to a multiple of 128; sublane-pad the batch.
    d_in_p = _round_up(d_in, 128)
    h_p = _round_up(h, 128)
    d_out_p = _round_up(d_out, 128)
    TB = min(tb, _round_up(B, 8))
    B_p = _round_up(B, TB)

    # Zero-padded, bf16-cast operands (zeros in padded rows/cols keep the math
    # exact: padded hidden lanes are ReLU(0 + 0) = 0 and multiply zero weights).
    xp = jnp.zeros((B_p, d_in_p), jnp.bfloat16).at[:B, :d_in].set(
        x.astype(jnp.bfloat16))
    w1p = jnp.zeros((d_in_p, h_p), jnp.bfloat16).at[:d_in, :h].set(
        w1.astype(jnp.bfloat16))
    w2p = jnp.zeros((h_p, h_p), jnp.bfloat16).at[:h, :h].set(
        w2.astype(jnp.bfloat16))
    w3p = jnp.zeros((h_p, d_out_p), jnp.bfloat16).at[:h, :d_out].set(
        w3.astype(jnp.bfloat16))

    bias = jnp.zeros((1, 2 * h_p + d_out_p), jnp.float32)
    bias = bias.at[:, 0:h].set(b1)
    bias = bias.at[:, h_p:h_p + h].set(b2)
    bias = bias.at[:, 2 * h_p:2 * h_p + d_out].set(b3)

    # Explicit VMEM budget: resident weights (x2 for buffering) + double-
    # buffered x/out tiles + f32 activations + headroom.
    weight_bytes = (d_in_p * h_p + h_p * h_p + h_p * d_out_p) * 2
    bias_bytes = (2 * h_p + d_out_p) * 4
    tile_bytes = 2 * (TB * d_in_p * 2 + TB * d_out_p * 4)
    act_bytes = 2 * TB * h_p * 4
    vmem_limit = 2 * (weight_bytes + bias_bytes) + 2 * tile_bytes + act_bytes
    vmem_limit = int(min(max(vmem_limit + (8 << 20), 32 << 20), 100 << 20))

    kernel = functools.partial(_dqn_kernel, h_p=h_p, d_out_p=d_out_p)

    out_padded = pl.pallas_call(
        kernel,
        out_shape=jax.ShapeDtypeStruct((B_p, d_out_p), jnp.float32),
        grid=(B_p // TB,),
        in_specs=[
            pl.BlockSpec((TB, d_in_p), lambda i: (i, 0)),       # x: batch-tiled
            pl.BlockSpec((d_in_p, h_p), lambda i: (0, 0)),      # W1: resident
            pl.BlockSpec((h_p, h_p), lambda i: (0, 0)),         # W2: resident
            pl.BlockSpec((h_p, d_out_p), lambda i: (0, 0)),     # W3: resident
            pl.BlockSpec((1, 2 * h_p + d_out_p), lambda i: (0, 0)),  # fused bias
        ],
        out_specs=pl.BlockSpec((TB, d_out_p), lambda i: (i, 0)),
        compiler_params=pltpu.CompilerParams(
            dimension_semantics=("parallel",),
            vmem_limit_bytes=vmem_limit,
        ),
    )(xp, w1p, w2p, w3p, bias)

    return out_padded[:B, :d_out]


def init_params(key, input_dim, hidden_dim, output_dim):
    """PyTorch nn.Linear default init: U(-1/sqrt(fan_in), 1/sqrt(fan_in))."""
    ks = jax.random.split(key, 6)

    def linear(kw, kb, fan_in, fan_out):
        bound = 1.0 / jnp.sqrt(fan_in)
        w = jax.random.uniform(kw, (fan_in, fan_out), jnp.float32, -bound, bound)
        b = jax.random.uniform(kb, (1, fan_out), jnp.float32, -bound, bound)
        return w, b

    w1, b1 = linear(ks[0], ks[1], input_dim, hidden_dim)
    w2, b2 = linear(ks[2], ks[3], hidden_dim, hidden_dim)
    w3, b3 = linear(ks[4], ks[5], hidden_dim, output_dim)
    return (w1, b1, w2, b2, w3, b3)


def dqn_reference(x, params, *, match_bf16=True):
    """Pure-JAX reference. With match_bf16=True it quantizes the matmul inputs
    to bf16 (exactly what the kernel's MXU path sees) while accumulating in f32."""
    w1, b1, w2, b2, w3, b3 = params

    def q(a):
        return a.astype(jnp.bfloat16).astype(jnp.float32) if match_bf16 else a

    h1 = jnp.maximum(q(x) @ q(w1) + b1, 0.0)
    h2 = jnp.maximum(q(h1) @ q(w2) + b2, 0.0)
    return q(h2) @ q(w3) + b3


if __name__ == "__main__":
    batch, input_dim, hidden_dim, output_dim = 2, 16, 32, 8

    key = jax.random.PRNGKey(0)
    k_x, k_p = jax.random.split(key)
    x = jax.random.normal(k_x, (batch, input_dim), dtype=jnp.float32)
    params = init_params(k_p, input_dim, hidden_dim, output_dim)

    out = dqn_forward(x, params)
    out = jax.block_until_ready(out)

    assert out.shape == (batch, output_dim)

    # Tight check vs a bf16-input / f32-accumulate reference (matches MXU path).
    ref_bf16 = dqn_reference(x, params, match_bf16=True)
    assert jnp.allclose(out, ref_bf16, atol=1e-3, rtol=1e-3), \
        "mismatch vs bf16-matched JAX reference"

    # Loose sanity check vs the full-f32 PyTorch-equivalent forward.
    ref_f32 = dqn_reference(x, params, match_bf16=False)
    assert jnp.allclose(out, ref_f32, atol=5e-2, rtol=5e-2), \
        "mismatch vs f32 JAX reference"

    print("KERNEL_OK")
</pallas_src>

<mosaic_0001>
module attributes {stable_mosaic.version = 11 : i64} {
  func.func @_dqn_kernel(%arg0: i32, %arg1: memref<8x128xbf16, #tpu.memory_space<vmem>>, %arg2: memref<128x128xbf16, #tpu.memory_space<vmem>>, %arg3: memref<128x128xbf16, #tpu.memory_space<vmem>>, %arg4: memref<128x128xbf16, #tpu.memory_space<vmem>>, %arg5: memref<1x384xf32, #tpu.memory_space<vmem>>, %arg6: memref<8x128xf32, #tpu.memory_space<vmem>>) attributes {dimension_semantics = [#tpu.dimension_semantics<parallel>], iteration_bounds = array<i64: 1>, scalar_prefetch = 0 : i64, scratch_operands = 0 : i64, tpu.core_type = #tpu.core_type<tc>, window_params = [{transform_indices = @transform_0, window_bounds = array<i64: 8, 128>}, {pipeline_mode = #tpu.pipeline_mode<synchronous>, transform_indices = @transform_1, window_bounds = array<i64: 128, 128>}, {pipeline_mode = #tpu.pipeline_mode<synchronous>, transform_indices = @transform_2, window_bounds = array<i64: 128, 128>}, {pipeline_mode = #tpu.pipeline_mode<synchronous>, transform_indices = @transform_3, window_bounds = array<i64: 128, 128>}, {pipeline_mode = #tpu.pipeline_mode<synchronous>, transform_indices = @transform_4, window_bounds = array<i64: 1, 384>}, {transform_indices = @transform_5, window_bounds = array<i64: 8, 128>}]} {
    %c0 = arith.constant 0 : index
    %c0_0 = arith.constant 0 : index
    %0 = vector.load %arg5[%c0, %c0_0] : memref<1x384xf32, #tpu.memory_space<vmem>>, vector<1x128xf32>
    %c0_1 = arith.constant 0 : index
    %c128 = arith.constant 128 : index
    %1 = vector.load %arg5[%c0_1, %c128] : memref<1x384xf32, #tpu.memory_space<vmem>>, vector<1x128xf32>
    %c0_2 = arith.constant 0 : index
    %c256 = arith.constant 256 : index
    %2 = vector.load %arg5[%c0_2, %c256] : memref<1x384xf32, #tpu.memory_space<vmem>>, vector<1x128xf32>
    %c0_3 = arith.constant 0 : index
    %c0_4 = arith.constant 0 : index
    %3 = vector.load %arg1[%c0_3, %c0_4] : memref<8x128xbf16, #tpu.memory_space<vmem>>, vector<8x128xbf16>
    %c0_5 = arith.constant 0 : index
    %c0_6 = arith.constant 0 : index
    %4 = vector.load %arg2[%c0_5, %c0_6] : memref<128x128xbf16, #tpu.memory_space<vmem>>, vector<128x128xbf16>
    %cst = arith.constant dense<0.000000e+00> : vector<8x128xf32>
    %5 = tpu.matmul %3, %4, %cst {dimension_numbers = #tpu.dot_dimension_numbers<[1], [0], [0], [1], [0, 0, 1, 1], [], []>} : vector<8x128xbf16>, vector<128x128xbf16>, vector<8x128xf32> -> vector<8x128xf32>
    %6 = vector.broadcast %0 : vector<1x128xf32> to vector<8x128xf32>
    %7 = arith.addf %5, %6 : vector<8x128xf32>
    %cst_7 = arith.constant 0.000000e+00 : f32
    %8 = vector.broadcast %cst_7 : f32 to vector<8x128xf32>
    %9 = arith.maximumf %7, %8 : vector<8x128xf32>
    %10 = arith.truncf %9 : vector<8x128xf32> to vector<8x128xbf16>
    %c0_8 = arith.constant 0 : index
    %c0_9 = arith.constant 0 : index
    %11 = vector.load %arg3[%c0_8, %c0_9] : memref<128x128xbf16, #tpu.memory_space<vmem>>, vector<128x128xbf16>
    %cst_10 = arith.constant dense<0.000000e+00> : vector<8x128xf32>
    %12 = tpu.matmul %10, %11, %cst_10 {dimension_numbers = #tpu.dot_dimension_numbers<[1], [0], [0], [1], [0, 0, 1, 1], [], []>} : vector<8x128xbf16>, vector<128x128xbf16>, vector<8x128xf32> -> vector<8x128xf32>
    %13 = vector.broadcast %1 : vector<1x128xf32> to vector<8x128xf32>
    %14 = arith.addf %12, %13 : vector<8x128xf32>
    %cst_11 = arith.constant 0.000000e+00 : f32
    %15 = vector.broadcast %cst_11 : f32 to vector<8x128xf32>
    %16 = arith.maximumf %14, %15 : vector<8x128xf32>
    %17 = arith.truncf %16 : vector<8x128xf32> to vector<8x128xbf16>
    %c0_12 = arith.constant 0 : index
    %c0_13 = arith.constant 0 : index
    %18 = vector.load %arg4[%c0_12, %c0_13] : memref<128x128xbf16, #tpu.memory_space<vmem>>, vector<128x128xbf16>
    %cst_14 = arith.constant dense<0.000000e+00> : vector<8x128xf32>
    %19 = tpu.matmul %17, %18, %cst_14 {dimension_numbers = #tpu.dot_dimension_numbers<[1], [0], [0], [1], [0, 0, 1, 1], [], []>} : vector<8x128xbf16>, vector<128x128xbf16>, vector<8x128xf32> -> vector<8x128xf32>
    %20 = vector.broadcast %2 : vector<1x128xf32> to vector<8x128xf32>
    %21 = arith.addf %19, %20 : vector<8x128xf32>
    %c0_15 = arith.constant 0 : index
    %c0_16 = arith.constant 0 : index
    %22 = vector.load %arg6[%c0_15, %c0_16] : memref<8x128xf32, #tpu.memory_space<vmem>>, vector<8x128xf32>
    tpu.vector_store %arg6[%c0_15, %c0_16], %21 {strides = array<i32>} : memref<8x128xf32, #tpu.memory_space<vmem>>, vector<8x128xf32>,
    return
  }
  func.func @transform_0(%arg0: i32) -> (i32, i32) {
    %c0_i32 = arith.constant 0 : i32
    %c0_i32_0 = arith.constant 0 : i32
    return %arg0, %c0_i32 : i32, i32
  }
  func.func @transform_1(%arg0: i32) -> (i32, i32) {
    %c0_i32 = arith.constant 0 : i32
    %c0_i32_0 = arith.constant 0 : i32
    %c0_i32_1 = arith.constant 0 : i32
    return %c0_i32, %c0_i32_0 : i32, i32
  }
  func.func @transform_2(%arg0: i32) -> (i32, i32) {
    %c0_i32 = arith.constant 0 : i32
    %c0_i32_0 = arith.constant 0 : i32
    %c0_i32_1 = arith.constant 0 : i32
    return %c0_i32, %c0_i32_0 : i32, i32
  }
  func.func @transform_3(%arg0: i32) -> (i32, i32) {
    %c0_i32 = arith.constant 0 : i32
    %c0_i32_0 = arith.constant 0 : i32
    %c0_i32_1 = arith.constant 0 : i32
    return %c0_i32, %c0_i32_0 : i32, i32
  }
  func.func @transform_4(%arg0: i32) -> (i32, i32) {
    %c0_i32 = arith.constant 0 : i32
    %c0_i32_0 = arith.constant 0 : i32
    %c0_i32_1 = arith.constant 0 : i32
    return %c0_i32, %c0_i32_0 : i32, i32
  }
  func.func @transform_5(%arg0: i32) -> (i32, i32) {
    %c0_i32 = arith.constant 0 : i32
    %c0_i32_0 = arith.constant 0 : i32
    return %arg0, %c0_i32 : i32, i32
  }
}

</mosaic_0001>

<bundles_post_ra>
// kernel: tpu_custom_call.1
= control target key start
LH: loop header
LB: loop body
LE: loop exit
PB: predicated region body
PF: predicated region fallthrough
CT: control target
= control target key end

     0   :  { %10 = vsyncpa [#allocation3], 0  ;;  %s843_s0 = inlined_call_operand.hbm [shape: bf16[8,128], index: 0, kind: input, shape index: {}]   ;;  %s844_s1 = inlined_call_operand.hbm [shape: bf16[128,128], index: 1, kind: input, shape index: {}]   ;;  %s845_s2 = inlined_call_operand.hbm [shape: bf16[128,128], index: 2, kind: input, shape index: {}]   ;;  %s846_s3 = inlined_call_operand.hbm [shape: bf16[128,128], index: 3, kind: input, shape index: {}]   ;;  %s847_s4 = inlined_call_operand.vmem [shape: f32[1,384], index: 4, kind: input, shape index: {}]   ;;  %s848_s5 = inlined_call_operand.hbm [shape: f32[8,128], index: 5, kind: output, shape index: {}]  }
   0x1   :  { %11 = vsyncpa [#allocation6], 0 }
   0x2   :  { %12 = vsyncpa [#allocation9], 0 }
   0x3   :  { %13 = vsyncpa [#allocation4], 0  ;;  %s696_s18 = smov [#allocation5]   ;;  %s578_s22 = scalar_lea.hbm %s844_s1, 1024 }
   0x4   :  { %s29_s19 = sshll.u32 %s696_s18, 4  ;;  %p579_p0 = scmp.ne.s32.totalorder %s844_s1, %s578_s22  ;;  %s30_s19 = int_to_ptr.vmem [resolvable:$true] %s29_s19 }
   0x5   :  { %p582_p1 = scmp.lt.u32.totalorder %s578_s22, %s844_s1 }
   0x7   :  { %p584_p2 = pnand %p582_p1, %p579_p0 }
   0x9   :  { %587 = shalt.err (!%p584_p2)
}
   0xa   :  { %s588_s27 = scalar_lea.vmem %s30_s19, 1024  ;;  %p593_p4 = scmp.lt.s32.totalorder %s30_s19, %s30_s19 }
   0xb   :  { %p589_p3 = scmp.ne.s32.totalorder %s30_s19, %s588_s27  ;;  %p594_p5 = scmp.lt.s32.totalorder %s588_s27, %s588_s27 }
   0xd   :  { %p595_p6 = por %p594_p5, %p593_p4 }
   0xf   :  { %p596_p7 = pnand %p595_p6, %p589_p3 }
  0x11   :  { %599 = shalt.err (!%p596_p7)
}
  0x12   :  { %s697_s28 = smov 64   ;;  %s698_s29 = smov 4  }
  0x13   :  { %35 = dma.hbm_to_vmem [thread:$0]  %s844_s1, 1024, %s30_s19, [#allocation6], %s697_s28, %s697_s28, %s698_s29  }
  0x14   :  { %s699_s7 = smov [#allocation2]   ;;  %s700_s9 = smov [#allocation7]  }
  0x15   :  { %s20_s8 = sshll.u32 %s699_s7, 4  ;;  %s41_s10 = sshll.u32 %s700_s9, 4  ;;  %s21_s8 = int_to_ptr.vmem [resolvable:$true] %s20_s8  ;;  %s42_s10 = int_to_ptr.vmem [resolvable:$true] %s41_s10 }
  0x16   :  { %s600_s13 = scalar_lea.hbm %s843_s0, 64 }
  0x17   :  { %p601_p8 = scmp.ne.s32.totalorder %s843_s0, %s600_s13  ;;  %p604_p9 = scmp.lt.u32.totalorder %s600_s13, %s843_s0 }
  0x19   :  { %p606_p10 = pnand %p604_p9, %p601_p8 }
  0x1b   :  { %609 = shalt.err (!%p606_p10)
}
  0x1c   :  { %s610_s1 = scalar_lea.vmem %s21_s8, 64  ;;  %p615_p12 = scmp.lt.s32.totalorder %s21_s8, %s21_s8 }
  0x1d   :  { %p611_p11 = scmp.ne.s32.totalorder %s21_s8, %s610_s1  ;;  %p616_p13 = scmp.lt.s32.totalorder %s610_s1, %s610_s1 }
  0x1f   :  { %p617_p0 = por %p616_p13, %p615_p12 }
  0x21   :  { %p618_p1 = pnand %p617_p0, %p611_p11 }
  0x23   :  { %621 = shalt.err (!%p618_p1)
}
  0x24   :  { %23 = dma.hbm_to_vmem [thread:$0]  %s843_s0, 64, %s21_s8, [#allocation3]  }
  0x25   :  { %s622_s22 = scalar_lea.hbm %s845_s2, 1024 }
  0x26   :  { %p623_p2 = scmp.ne.s32.totalorder %s845_s2, %s622_s22  ;;  %p626_p3 = scmp.lt.u32.totalorder %s622_s22, %s845_s2 }
  0x28   :  { %p628_p4 = pnand %p626_p3, %p623_p2 }
  0x2a   :  { %631 = shalt.err (!%p628_p4)
}
  0x2b   :  { %s632_s27 = scalar_lea.vmem %s42_s10, 1024  ;;  %p637_p6 = scmp.lt.s32.totalorder %s42_s10, %s42_s10 }
  0x2c   :  { %p633_p5 = scmp.ne.s32.totalorder %s42_s10, %s632_s27  ;;  %p638_p7 = scmp.lt.s32.totalorder %s632_s27, %s632_s27 }
  0x2e   :  { %p639_p8 = por %p638_p7, %p637_p6 }
  0x30   :  { %p640_p9 = pnand %p639_p8, %p633_p5 }
  0x32   :  { %643 = shalt.err (!%p640_p9)
}
  0x33   :  { %47 = dma.hbm_to_vmem [thread:$0]  %s845_s2, 1024, %s42_s10, [#allocation6], %s697_s28, %s697_s28, %s698_s29  }
  0x34   :  { %s701_s6 = smov [#allocation8]   ;;  %s644_s11 = scalar_lea.hbm %s846_s3, 1024 }
  0x35   :  { %s53_s7 = sshll.u32 %s701_s6, 4  ;;  %p645_p10 = scmp.ne.s32.totalorder %s846_s3, %s644_s11  ;;  %s54_s7 = int_to_ptr.vmem [resolvable:$true] %s53_s7 }
  0x36   :  { %p648_p11 = scmp.lt.u32.totalorder %s644_s11, %s846_s3 }
  0x38   :  { %p650_p12 = pnand %p648_p11, %p645_p10 }
  0x3a   :  { %653 = shalt.err (!%p650_p12)
}
  0x3b   :  { %s654_s16 = scalar_lea.vmem %s54_s7, 1024  ;;  %p659_p0 = scmp.lt.s32.totalorder %s54_s7, %s54_s7 }
  0x3c   :  { %p655_p13 = scmp.ne.s32.totalorder %s54_s7, %s654_s16  ;;  %p660_p1 = scmp.lt.s32.totalorder %s654_s16, %s654_s16 }
  0x3e   :  { %p661_p2 = por %p660_p1, %p659_p0 }
  0x40   :  { %p662_p3 = pnand %p661_p2, %p655_p13 }
  0x42   :  { %665 = shalt.err (!%p662_p3)
}
  0x43   :  { %59 = dma.hbm_to_vmem [thread:$0]  %s846_s3, 1024, %s54_s7, [#allocation9], %s697_s28, %s697_s28, %s698_s29  }
  0x44   :  { %688 = dma.done.wait [#allocation3], 64  }
  0x45   :  { %689 = vsyncadd [#allocation3], 4294967232 }
  0x46   :  { %690 = dma.done.wait [#allocation6], 2048  }
  0x47   :  { %691 = vsyncadd [#allocation6], 4294965248 }
  0x48   :  { %692 = dma.done.wait [#allocation9], 1024  }
  0x49   :  { %693 = vsyncadd [#allocation9], 4294966272  ;;  %v702_v0 = vmov 0.0   ;;  %vm703_vm0 = vmmov 0   ;;  %v554_v1 = vld [vmem:[#allocation5] sm:$0xff]   ;;  %v555_v2 = vld [vmem:[#allocation5 + $0x8] sm:$0xff]  }
  0x4a   :  { %485 = vmatprep.subr.bf16.mxu0 %v702_v0  ;;  %501 = vmatprep.mubr.msk.bf16.mxu0 %vm703_vm0, %v702_v0  ;;  %v556_v3 = vld [vmem:[#allocation5 + $0x10] sm:$0xff]   ;;  %v562_v4 = vld [vmem:[#allocation7] sm:$0xff]   ;;  %v557_v5 = vld [vmem:[#allocation5 + $0x18] sm:$0xff]   ;;  %s704_s19 = smov [#allocation10]  }
  0x4b   :  { %505 = vmatprep.subr.bf16.mxu1 %v702_v0  ;;  %521 = vmatprep.mubr.msk.bf16.mxu1 %vm703_vm0, %v702_v0  ;;  %v563_v6 = vld [vmem:[#allocation7 + $0x8] sm:$0xff]   ;;  %v558_v7 = vld [vmem:[#allocation5 + $0x20] sm:$0xff]   ;;  %v564_v8 = vld [vmem:[#allocation7 + $0x10] sm:$0xff]   ;;  %s420_s20 = sshll.u32 %s704_s19, 4  ;;  %s421_s20 = int_to_ptr.vmem [resolvable:$true] %s420_s20 }
  0x4c   :  { %486 = vmatpush3.bf16.msra.mxu0 %v554_v1  ;;  %506 = vmatpush3.bf16.msra.mxu1 %v562_v4  ;;  %v559_v9 = vld [vmem:[#allocation5 + $0x28] sm:$0xff]   ;;  %v565_v10 = vld [vmem:[#allocation7 + $0x18] sm:$0xff]   ;;  %v560_v11 = vld [vmem:[#allocation5 + $0x30] sm:$0xff]   ;;  %s666_s21 = scalar_lea.vmem %s421_s20, 128  ;;  %p671_p5 = scmp.lt.s32.totalorder %s421_s20, %s421_s20 }
  0x4d   :  { %487 = vmatprep.subr.bf16.mxu0 %v702_v0  ;;  %507 = vmatprep.subr.bf16.mxu1 %v702_v0  ;;  %v566_v12 = vld [vmem:[#allocation7 + $0x20] sm:$0xff]   ;;  %v561_v13 = vld [vmem:[#allocation5 + $0x38] sm:$0xff]   ;;  %v567_v14 = vld [vmem:[#allocation7 + $0x28] sm:$0xff]   ;;  %p667_p4 = scmp.ne.s32.totalorder %s421_s20, %s666_s21  ;;  %p672_p6 = scmp.lt.s32.totalorder %s666_s21, %s666_s21 }
  0x4e   :  { %v78_v15 = vld [vmem:[#allocation2] sm:$0xf]  ;;  %v568_v16 = vld [vmem:[#allocation7 + $0x30] sm:$0xff]   ;;  %v570_v18 = vld [vmem:[#allocation8] sm:$0xff]  }
  0x4f   :  { %v569_v17 = vld [vmem:[#allocation7 + $0x38] sm:$0xff]   ;;  %v571_v19 = vld [vmem:[#allocation8 + $0x8] sm:$0xff]   ;;  %v572_v20 = vld [vmem:[#allocation8 + $0x10] sm:$0xff]   ;;  %p673_p7 = por %p672_p6, %p671_p5 }
  0x50   :  { %488 = vmatpush3.bf16.msra.mxu0 %v555_v2  ;;  %508 = vmatpush3.bf16.msra.mxu1 %v563_v6  ;;  %v573_v21 = vld [vmem:[#allocation8 + $0x18] sm:$0xff]   ;;  %v574_v22 = vld [vmem:[#allocation8 + $0x20] sm:$0xff]   ;;  %v575_v23 = vld [vmem:[#allocation8 + $0x28] sm:$0xff]  }
  0x51   :  { %489 = vmatprep.subr.bf16.mxu0 %v702_v0  ;;  %509 = vmatprep.subr.bf16.mxu1 %v702_v0  ;;  %v431_v24 = vld [vmem:[%s847_s4] ss:$0 sm:$0xff]  ;;  %v576_v32 = vld [vmem:[#allocation8 + $0x30] sm:$0xff]   ;;  %v440_v34 = vld [vmem:[%s847_s4 + $0x1] ss:$0 sm:$0xff]  ;;  %p674_p8 = pnand %p673_p7, %p667_p4 }
  0x52   :  { %v577_v33 = vld [vmem:[#allocation8 + $0x38] sm:$0xff]  }
  0x53   :  { %v449_v42 = vld [vmem:[%s847_s4 + $0x2] ss:$0 sm:$0xff] }
  0x54   :  { %490 = vmatpush3.bf16.msra.mxu0 %v556_v3  ;;  %510 = vmatpush3.bf16.msra.mxu1 %v564_v8 }
  0x55   :  { %491 = vmatprep.subr.bf16.mxu0 %v702_v0  ;;  %511 = vmatprep.subr.bf16.mxu1 %v702_v0 }
  0x58   :  { %492 = vmatpush3.bf16.msra.mxu0 %v557_v5  ;;  %512 = vmatpush3.bf16.msra.mxu1 %v565_v10 }
  0x59   :  { %493 = vmatprep.subr.bf16.mxu0 %v702_v0  ;;  %513 = vmatprep.subr.bf16.mxu1 %v702_v0 }
  0x5c   :  { %494 = vmatpush3.bf16.msra.mxu0 %v558_v7  ;;  %514 = vmatpush3.bf16.msra.mxu1 %v566_v12 }
  0x5d   :  { %495 = vmatprep.subr.bf16.mxu0 %v702_v0  ;;  %515 = vmatprep.subr.bf16.mxu1 %v702_v0 }
  0x60   :  { %496 = vmatpush3.bf16.msra.mxu0 %v559_v9  ;;  %516 = vmatpush3.bf16.msra.mxu1 %v567_v14 }
  0x61   :  { %497 = vmatprep.subr.bf16.mxu0 %v702_v0  ;;  %517 = vmatprep.subr.bf16.mxu1 %v702_v0 }
  0x64   :  { %498 = vmatpush3.bf16.msra.mxu0 %v560_v11  ;;  %518 = vmatpush3.bf16.msra.mxu1 %v568_v16 }
  0x65   :  { %499 = vmatprep.subr.bf16.mxu0 %v702_v0  ;;  %519 = vmatprep.subr.bf16.mxu1 %v702_v0 }
  0x68   :  { %500 = vmatpush3.bf16.msra.mxu0 %v561_v13  ;;  %520 = vmatpush3.bf16.msra.mxu1 %v569_v17 }
  0x69   :  { %525 = vmatprep.subr.bf16.mxu0 %v702_v0 }
  0x6b   :  { %502 = vmatmul.mubr.bf16.vlgmr.msra.gmra.mrb[0].mxu0 %v78_v15 }
  0x6c   :  { %541 = vmatprep.mubr.msk.bf16.mxu0 %vm703_vm0, %v702_v0  ;;  %526 = vmatpush3.bf16.msra.mxu0 %v570_v18 }
  0x6d   :  { %527 = vmatprep.subr.bf16.mxu0 %v702_v0 }
  0x70   :  { %528 = vmatpush3.bf16.msra.mxu0 %v571_v19 }
  0x71   :  { %529 = vmatprep.subr.bf16.mxu0 %v702_v0 }
  0x74   :  { %530 = vmatpush3.bf16.msra.mxu0 %v572_v20 }
  0x75   :  { %531 = vmatprep.subr.bf16.mxu0 %v702_v0 }
  0x78   :  { %532 = vmatpush3.bf16.msra.mxu0 %v573_v21 }
  0x79   :  { %533 = vmatprep.subr.bf16.mxu0 %v702_v0 }
  0x7c   :  { %534 = vmatpush3.bf16.msra.mxu0 %v574_v22 }
  0x7d   :  { %535 = vmatprep.subr.bf16.mxu0 %v702_v0 }
  0x80   :  { %536 = vmatpush3.bf16.msra.mxu0 %v575_v23 }
  0x81   :  { %537 = vmatprep.subr.bf16.mxu0 %v702_v0 }
  0x84   :  { %538 = vmatpush3.bf16.msra.mxu0 %v576_v32 }
  0x85   :  { %539 = vmatprep.subr.bf16.mxu0 %v702_v0 }
  0x88   :  { %540 = vmatpush3.bf16.msra.mxu0 %v577_v33 }
 0x13e   :  { %v183_v25 = vpop.f32.mrb[0].mxu0 }
 0x13f   :  { %v184_v26 = vadd.f32 %v431_v24, %v183_v25  ;;  %v503_v27 = vpop.f32.mrb[1].mxu0 }
 0x140   :  { %v186_v28 = vpop.f32.mrb[2].mxu0 }
 0x141   :  { %v189_v29 = vmax.f32 %v184_v26, 0.0  ;;  %v504_v30 = vpop.f32.mrb[3].mxu0 }
 0x143   :  { %v190_v31 = vpack.c.bf16 %v189_v29, %v189_v29 }
 0x145   :  { %522 = vmatmul.mubr.bf16.vlgmr.msra.gmra.mrb[0].mxu1 %v190_v31 }
 0x218   :  { %v295_v35 = vpop.f32.mrb[0].mxu1 }
 0x219   :  { %v296_v36 = vadd.f32 %v440_v34, %v295_v35  ;;  %v523_v37 = vpop.f32.mrb[1].mxu1 }
 0x21a   :  { %v298_v38 = vpop.f32.mrb[2].mxu1 }
 0x21b   :  { %v301_v39 = vmax.f32 %v296_v36, 0.0  ;;  %v524_v40 = vpop.f32.mrb[3].mxu1 }
 0x21d   :  { %v302_v41 = vpack.c.bf16 %v301_v39, %v301_v39 }
 0x21f   :  { %542 = vmatmul.mubr.bf16.vlgmr.msra.gmra.mrb[4].mxu0 %v302_v41 }
 0x2f2   :  { %v407_v43 = vpop.f32.mrb[4].mxu0 }
 0x2f3   :  { %v408_v44 = vadd.f32 %v449_v42, %v407_v43  ;;  %v543_v45 = vpop.f32.mrb[5].mxu0 }
 0x2f4   :  { %v410_v46 = vpop.f32.mrb[6].mxu0 }
 0x2f5   :  { %413 = vst [vmem:[#allocation10] sm:$0xff] %v408_v44  ;;  %v544_v47 = vpop.f32.mrb[7].mxu0 }
 0x2f6   :  { %677 = shalt.err (!%p674_p8)
}
 0x2f7   :  { %s678_s4 = scalar_lea.hbm %s848_s5, 128 }
 0x2f8   :  { %p679_p9 = scmp.ne.s32.totalorder %s848_s5, %s678_s4  ;;  %p682_p10 = scmp.lt.u32.totalorder %s678_s4, %s848_s5 }
 0x2fa   :  { %p684_p11 = pnand %p682_p10, %p679_p9 }
 0x2fc   :  { %687 = shalt.err (!%p684_p11)
}
 0x2fd   :  { %423 = dma.vmem_to_hbm [thread:$0]  %s421_s20, 128, %s848_s5, [#allocation4]  }
 0x2fe   :  { %694 = dma.done.wait [#allocation4], 128  }
 0x2ff   :  { %695 = vsyncadd [#allocation4], 4294967168 }
 0x300   :  { %427 = vsyncpa [#allocation3], 1 }
 0x301   :  { %428 = vsyncpa [#allocation6], 1 }
 0x302   :  { %429 = vsyncpa [#allocation9], 1 }
 0x303   :  { %430 = vsyncpa [#allocation4], 1 }

</bundles_post_ra>
